<compile_context>
chip_gen: v7x
topology: tpu7x:2x2x1
jax: 0.10.0
libtpu: 0.0.40
codegen_flags: <defaults>
</compile_context>

<pallas_src>
import functools

import jax
import jax.numpy as jnp
from jax import lax
from jax.experimental import pallas as pl
from jax.experimental.pallas import tpu as pltpu

_LOG2E = 1.4426950408889634   # log2(e); softmax is evaluated in the exp2 domain
_MASK_VALUE = -1e30           # additive bias for padded K columns


def _flash_sdpa_kernel(*refs, q_scale, has_bias, mxu_dtype):
    """One (batch, q-tile); online softmax over the kv grid axis (axis 2).

    refs (in order): q (tq,D), k (tk,D), v (tk,Dv), [bias (1,tk)], o (tq,Dv),
                     qs (tq,D) scratch, m (tq,1), l (tq,1), acc (tq,Dv).
    """
    if has_bias:
        (q_ref, k_ref, v_ref, bias_ref, o_ref,
         qs_ref, m_ref, l_ref, acc_ref) = refs
    else:
        (q_ref, k_ref, v_ref, o_ref,
         qs_ref, m_ref, l_ref, acc_ref) = refs
        bias_ref = None

    kv = pl.program_id(2)

    @pl.when(kv == 0)
    def _init():
        # Fold scale * log2(e) into Q once per q-tile and cache it in VMEM,
        # instead of re-multiplying q_ref on every kv step.
        qs_ref[...] = (q_ref[...].astype(jnp.float32) * q_scale).astype(mxu_dtype)
        m_ref[...] = jnp.full(m_ref.shape, -jnp.inf, dtype=jnp.float32)
        l_ref[...] = jnp.zeros(l_ref.shape, dtype=jnp.float32)
        acc_ref[...] = jnp.zeros(acc_ref.shape, dtype=jnp.float32)

    q = qs_ref[...]
    k = k_ref[...].astype(mxu_dtype)
    v = v_ref[...].astype(mxu_dtype)

    # Scores (already in the log2 domain): contract the last dims -> Q @ K^T
    # with no explicit transpose; f32 accumulation on the MXU.
    s = lax.dot_general(q, k, (((1,), (1,)), ((), ())),
                        preferred_element_type=jnp.float32)      # (tq, tk)
    if has_bias:
        s = s + bias_ref[...]           # 0 for valid columns, -1e30 for padding

    m_prev = m_ref[...]
    m_new = jnp.maximum(m_prev, jnp.max(s, axis=-1, keepdims=True))
    alpha = jnp.exp2(m_prev - m_new)                              # (tq, 1)
    p = jnp.exp2(s - m_new)                                       # (tq, tk) f32

    l_ref[...] = alpha * l_ref[...] + jnp.sum(p, axis=-1, keepdims=True)
    acc_ref[...] = alpha * acc_ref[...] + jnp.dot(
        p.astype(mxu_dtype), v, preferred_element_type=jnp.float32)
    m_ref[...] = m_new

    @pl.when(kv == pl.num_programs(2) - 1)
    def _finalize():
        # Exact reciprocal: once per q-tile over tq values, so the approximate
        # EUP path buys nothing and previously broke the "no scale" tolerance.
        inv_l = 1.0 / l_ref[...]
        o_ref[...] = (acc_ref[...] * inv_l).astype(o_ref.dtype)


def _round_up(x, m):
    return ((x + m - 1) // m) * m


def scaled_dot_product_attention(Q, K, V, scale=None, *,
                                 tq_max=512, tk_max=1024,
                                 use_bf16_mxu=False, kv_buffers=None):
    """Pallas TPU implementation of Scaled_Dot_Product_Attention.forward.

    Q: (B, Lq, D), K: (B, Lk, D), V: (B, Lk, Dv) -> (B, Lq, Dv).

    NOTE: `scale` follows the PyTorch module's `if scale:` truthiness —
    both None and 0.0 mean "no scaling" (not "zero the logits").

    use_bf16_mxu: cast f32 MXU operands to bf16 (accumulation stays f32) for
    the bf16-native MXUs on v6e/v7x; widens tolerance vs an f32 reference.
    kv_buffers: e.g. 3 to deepen K/V pipelining (v5e exposed-DMA cases only).
    """
    B, Lq, D = Q.shape
    Bk, Lk, Dk = K.shape
    Bv, Lkv, Dv = V.shape
    assert B == Bk == Bv and D == Dk and Lk == Lkv

    in_dtype = Q.dtype
    mxu_dtype = jnp.bfloat16 if (use_bf16_mxu and in_dtype == jnp.float32) else in_dtype

    # exp2-domain softmax: fold scale (PyTorch truthiness) * log2(e) into Q.
    q_scale = (float(scale) * _LOG2E) if scale else _LOG2E

    # Tile sizes: q tiles rounded to the dtype's sublane packing (8 f32 /
    # 16 bf16 / 32 int8); kv tiles lane-dense (multiple of 128).
    sub = max(8, 32 // in_dtype.itemsize)
    tq = min(_round_up(tq_max, sub), _round_up(Lq, sub))
    tk = min(_round_up(tk_max, 128), _round_up(Lk, 128))
    Lq_p = _round_up(Lq, tq)
    Lk_p = _round_up(Lk, tk)

    # Pad only the sequence dims, and only when needed; feature dims use
    # full-extent blocks (legal: block dim == full array dim), so there is no
    # pad/slice HBM pass and no inflated Q/K traffic for small head dims.
    def _pad_seq(x, L_p):
        return x if x.shape[1] == L_p else jnp.pad(
            x, ((0, 0), (0, L_p - x.shape[1]), (0, 0)))

    Qp, Kp, Vp = _pad_seq(Q, Lq_p), _pad_seq(K, Lk_p), _pad_seq(V, Lk_p)

    nq, nk = Lq_p // tq, Lk_p // tk
    needs_mask = Lk_p != Lk

    kv_pm = {} if kv_buffers is None else {"pipeline_mode": pl.Buffered(kv_buffers)}
    in_specs = [
        pl.BlockSpec((pl.Squeezed(), tq, D), lambda b, qi, ki: (b, qi, 0)),
        pl.BlockSpec((pl.Squeezed(), tk, D), lambda b, qi, ki: (b, ki, 0), **kv_pm),
        pl.BlockSpec((pl.Squeezed(), tk, Dv), lambda b, qi, ki: (b, ki, 0), **kv_pm),
    ]
    inputs = [Qp, Kp, Vp]
    if needs_mask:
        # Additive bias row: 0 for valid K columns, -1e30 for kv padding.
        col = lax.broadcasted_iota(jnp.int32, (1, Lk_p), 1)
        inputs.append(jnp.where(col < Lk, 0.0, _MASK_VALUE).astype(jnp.float32))
        in_specs.append(pl.BlockSpec((1, tk), lambda b, qi, ki: (0, ki)))

    kernel = functools.partial(_flash_sdpa_kernel, q_scale=q_scale,
                               has_bias=needs_mask, mxu_dtype=mxu_dtype)

    # Explicit VMEM budget so large tiles don't trip the 16 MiB (v5e) scoped
    # default; capped at 64 MiB (v7x physical VMEM per TensorCore).
    ib = in_dtype.itemsize
    mb = 2 if mxu_dtype == jnp.bfloat16 else ib
    est = (2 * tq * D * ib + 2 * tk * D * ib + 2 * tk * Dv * ib   # Q/K/V (2x buf)
           + 2 * tq * Dv * ib                                     # O (2x buf)
           + tq * D * mb + tq * Dv * 4 + 2 * tq * 4               # scratch
           + 3 * tq * tk * 4)                                     # s/p intermediates
    vmem_limit = min(max(int(1.5 * est) + (8 << 20), 32 << 20), 64 << 20)

    out = pl.pallas_call(
        kernel,
        out_shape=jax.ShapeDtypeStruct((B, Lq_p, Dv), in_dtype),
        grid_spec=pltpu.PrefetchScalarGridSpec(
            num_scalar_prefetch=0,
            grid=(B, nq, nk),
            in_specs=in_specs,
            out_specs=pl.BlockSpec((pl.Squeezed(), tq, Dv),
                                   lambda b, qi, ki: (b, qi, 0)),
            scratch_shapes=[
                pltpu.VMEM((tq, D), mxu_dtype),       # cached scaled Q
                pltpu.VMEM((tq, 1), jnp.float32),     # running max m (log2)
                pltpu.VMEM((tq, 1), jnp.float32),     # running denom l
                pltpu.VMEM((tq, Dv), jnp.float32),    # running numerator acc
            ],
        ),
        compiler_params=pltpu.CompilerParams(
            # B / q-tile axes are independent ("parallel" -> megacore-sharded
            # across v7x's 2 TensorCores); kv reduction is innermost "arbitrary".
            dimension_semantics=("parallel", "parallel", "arbitrary"),
            vmem_limit_bytes=vmem_limit,
        ),
    )(*inputs)

    return out if Lq_p == Lq else out[:, :Lq, :]


def _reference(Q, K, V, scale=None):
    s = jnp.einsum("bqd,bkd->bqk", Q, K)
    if scale:
        s = s * scale
    attn = jax.nn.softmax(s, axis=-1)
    return jnp.einsum("bqk,bkd->bqd", attn, V)


if __name__ == "__main__":
    key = jax.random.PRNGKey(0)
    kq, kk, kvk = jax.random.split(key, 3)

    # Small shapes consistent with the module: batch=2, seq=8, hidden=32.
    B, L, D = 2, 8, 32
    Q = jax.random.normal(kq, (B, L, D), dtype=jnp.float32)
    K = jax.random.normal(kk, (B, L, D), dtype=jnp.float32)
    V = jax.random.normal(kvk, (B, L, D), dtype=jnp.float32)

    scale = 1.0 / (D ** 0.5)

    out = jax.block_until_ready(scaled_dot_product_attention(Q, K, V, scale=scale))
    ref = _reference(Q, K, V, scale=scale)
    assert out.shape == (B, L, D)
    assert jnp.allclose(out, ref, atol=1e-3, rtol=1e-3), "mismatch vs reference"

    # scale=None path (PyTorch default) — exact reciprocal keeps this tight.
    out2 = jax.block_until_ready(scaled_dot_product_attention(Q, K, V))
    ref2 = _reference(Q, K, V)
    assert jnp.allclose(out2, ref2, atol=1e-3, rtol=1e-3), "mismatch (no scale)"

    # Multi-kv-tile online softmax + padded-column bias masking.
    kq2, kk2, kv2 = jax.random.split(jax.random.PRNGKey(1), 3)
    B2, Lq2, Lk2, D2 = 2, 24, 200, 32
    Q2 = jax.random.normal(kq2, (B2, Lq2, D2), dtype=jnp.float32)
    K2 = jax.random.normal(kk2, (B2, Lk2, D2), dtype=jnp.float32)
    V2 = jax.random.normal(kv2, (B2, Lk2, D2), dtype=jnp.float32)
    s2 = 1.0 / (D2 ** 0.5)
    out3 = jax.block_until_ready(
        scaled_dot_product_attention(Q2, K2, V2, scale=s2, tk_max=128))
    ref3 = _reference(Q2, K2, V2, scale=s2)
    assert jnp.allclose(out3, ref3, atol=1e-3, rtol=1e-3), "mismatch (tiled/masked)"

    # bf16-MXU-operand fast path (v6e/v7x): f32 accumulation, looser tolerance.
    out4 = jax.block_until_ready(
        scaled_dot_product_attention(Q, K, V, scale=scale, use_bf16_mxu=True))
    assert jnp.allclose(out4, ref, atol=2e-2, rtol=2e-2), "mismatch (bf16 mxu)"

    print("KERNEL_OK")
</pallas_src>

<mosaic_0001>
module attributes {stable_mosaic.version = 11 : i64} {
  func.func @_flash_sdpa_kernel(%arg0: i32, %arg1: i32, %arg2: i32, %arg3: memref<1x8x32xf32, #tpu.memory_space<vmem>>, %arg4: memref<1x128x32xf32, #tpu.memory_space<vmem>>, %arg5: memref<1x128x32xf32, #tpu.memory_space<vmem>>, %arg6: memref<1x128xf32, #tpu.memory_space<vmem>>, %arg7: memref<1x8x32xf32, #tpu.memory_space<vmem>>, %arg8: memref<8x32xf32, #tpu.memory_space<vmem>>, %arg9: memref<8x1xf32, #tpu.memory_space<vmem>>, %arg10: memref<8x1xf32, #tpu.memory_space<vmem>>, %arg11: memref<8x32xf32, #tpu.memory_space<vmem>>) attributes {dimension_semantics = [#tpu.dimension_semantics<parallel>, #tpu.dimension_semantics<parallel>, #tpu.dimension_semantics<arbitrary>], iteration_bounds = array<i64: 2, 1, 1>, scalar_prefetch = 0 : i64, scratch_operands = 4 : i64, tpu.core_type = #tpu.core_type<tc>, window_params = [{transform_indices = @transform_0, window_bounds = array<i64: 1, 8, 32>}, {transform_indices = @transform_1, window_bounds = array<i64: 1, 128, 32>}, {transform_indices = @transform_2, window_bounds = array<i64: 1, 128, 32>}, {transform_indices = @transform_3, window_bounds = array<i64: 1, 128>}, {transform_indices = @transform_4, window_bounds = array<i64: 1, 8, 32>}]} {
    %c0_i32 = arith.constant 0 : i32
    %0 = arith.cmpi eq, %arg2, %c0_i32 : i32
    %1 = arith.extui %0 : i1 to i32
    %c0_i32_0 = arith.constant 0 : i32
    %2 = arith.cmpi ne, %1, %c0_i32_0 : i32
    scf.if %2 {
      %c0_27 = arith.constant 0 : index
      %c0_28 = arith.constant 0 : index
      %c0_29 = arith.constant 0 : index
      %37 = vector.load %arg3[%c0_27, %c0_28, %c0_29] : memref<1x8x32xf32, #tpu.memory_space<vmem>>, vector<1x8x32xf32>
      %38 = vector.shape_cast %37 : vector<1x8x32xf32> to vector<8x32xf32>
      %cst_30 = arith.constant 0.255034864 : f32
      %39 = vector.broadcast %cst_30 : f32 to vector<8x32xf32>
      %40 = arith.mulf %38, %39 : vector<8x32xf32>
      %c0_31 = arith.constant 0 : index
      %c0_32 = arith.constant 0 : index
      %41 = vector.load %arg8[%c0_31, %c0_32] : memref<8x32xf32, #tpu.memory_space<vmem>>, vector<8x32xf32>
      tpu.vector_store %arg8[%c0_31, %c0_32], %40 {strides = array<i32>} : memref<8x32xf32, #tpu.memory_space<vmem>>, vector<8x32xf32>,
      %cst_33 = arith.constant 0xFF800000 : f32
      %42 = vector.broadcast %cst_33 : f32 to vector<8x1xf32>
      %c0_34 = arith.constant 0 : index
      %c0_35 = arith.constant 0 : index
      %43 = vector.load %arg9[%c0_34, %c0_35] : memref<8x1xf32, #tpu.memory_space<vmem>>, vector<8x1xf32>
      tpu.vector_store %arg9[%c0_34, %c0_35], %42 {strides = array<i32>} : memref<8x1xf32, #tpu.memory_space<vmem>>, vector<8x1xf32>,
      %cst_36 = arith.constant 0.000000e+00 : f32
      %44 = vector.broadcast %cst_36 : f32 to vector<8x1xf32>
      %c0_37 = arith.constant 0 : index
      %c0_38 = arith.constant 0 : index
      %45 = vector.load %arg10[%c0_37, %c0_38] : memref<8x1xf32, #tpu.memory_space<vmem>>, vector<8x1xf32>
      tpu.vector_store %arg10[%c0_37, %c0_38], %44 {strides = array<i32>} : memref<8x1xf32, #tpu.memory_space<vmem>>, vector<8x1xf32>,
      %cst_39 = arith.constant 0.000000e+00 : f32
      %46 = vector.broadcast %cst_39 : f32 to vector<8x32xf32>
      %c0_40 = arith.constant 0 : index
      %c0_41 = arith.constant 0 : index
      %47 = vector.load %arg11[%c0_40, %c0_41] : memref<8x32xf32, #tpu.memory_space<vmem>>, vector<8x32xf32>
      tpu.vector_store %arg11[%c0_40, %c0_41], %46 {strides = array<i32>} : memref<8x32xf32, #tpu.memory_space<vmem>>, vector<8x32xf32>,
    } else {
    }
    %c0 = arith.constant 0 : index
    %c0_1 = arith.constant 0 : index
    %3 = vector.load %arg8[%c0, %c0_1] : memref<8x32xf32, #tpu.memory_space<vmem>>, vector<8x32xf32>
    %c0_2 = arith.constant 0 : index
    %c0_3 = arith.constant 0 : index
    %c0_4 = arith.constant 0 : index
    %4 = vector.load %arg4[%c0_2, %c0_3, %c0_4] : memref<1x128x32xf32, #tpu.memory_space<vmem>>, vector<1x128x32xf32>
    %5 = vector.shape_cast %4 : vector<1x128x32xf32> to vector<128x32xf32>
    %c0_5 = arith.constant 0 : index
    %c0_6 = arith.constant 0 : index
    %c0_7 = arith.constant 0 : index
    %6 = vector.load %arg5[%c0_5, %c0_6, %c0_7] : memref<1x128x32xf32, #tpu.memory_space<vmem>>, vector<1x128x32xf32>
    %7 = vector.shape_cast %6 : vector<1x128x32xf32> to vector<128x32xf32>
    %cst = arith.constant dense<0.000000e+00> : vector<8x128xf32>
    %8 = tpu.matmul %3, %5, %cst {dimension_numbers = #tpu.dot_dimension_numbers<[1], [1], [0], [0], [0, 0, 1, 0], [], []>} : vector<8x32xf32>, vector<128x32xf32>, vector<8x128xf32> -> vector<8x128xf32>
    %c0_8 = arith.constant 0 : index
    %c0_9 = arith.constant 0 : index
    %9 = vector.load %arg6[%c0_8, %c0_9] : memref<1x128xf32, #tpu.memory_space<vmem>>, vector<1x128xf32>
    %10 = vector.broadcast %9 : vector<1x128xf32> to vector<8x128xf32>
    %11 = arith.addf %8, %10 : vector<8x128xf32>
    %c0_10 = arith.constant 0 : index
    %c0_11 = arith.constant 0 : index
    %12 = vector.load %arg9[%c0_10, %c0_11] : memref<8x1xf32, #tpu.memory_space<vmem>>, vector<8x1xf32>
    %cst_12 = arith.constant dense<0xFF800000> : vector<8xf32>
    %13 = vector.multi_reduction <maximumf>, %11, %cst_12 [1] : vector<8x128xf32> to vector<8xf32>
    %14 = vector.shape_cast %13 : vector<8xf32> to vector<8x1xf32>
    %15 = arith.maximumf %12, %14 : vector<8x1xf32>
    %16 = arith.subf %12, %15 : vector<8x1xf32>
    %17 = math.exp2 %16 : vector<8x1xf32>
    %18 = vector.broadcast %15 : vector<8x1xf32> to vector<8x128xf32>
    %19 = arith.subf %11, %18 : vector<8x128xf32>
    %20 = math.exp2 %19 : vector<8x128xf32>
    %c0_13 = arith.constant 0 : index
    %c0_14 = arith.constant 0 : index
    %21 = vector.load %arg10[%c0_13, %c0_14] : memref<8x1xf32, #tpu.memory_space<vmem>>, vector<8x1xf32>
    %22 = arith.mulf %17, %21 : vector<8x1xf32>
    %cst_15 = arith.constant dense<0.000000e+00> : vector<8xf32>
    %23 = vector.multi_reduction <add>, %20, %cst_15 [1] : vector<8x128xf32> to vector<8xf32>
    %24 = vector.shape_cast %23 : vector<8xf32> to vector<8x1xf32>
    %25 = arith.addf %22, %24 : vector<8x1xf32>
    %c0_16 = arith.constant 0 : index
    %c0_17 = arith.constant 0 : index
    %26 = vector.load %arg10[%c0_16, %c0_17] : memref<8x1xf32, #tpu.memory_space<vmem>>, vector<8x1xf32>
    tpu.vector_store %arg10[%c0_16, %c0_17], %25 {strides = array<i32>} : memref<8x1xf32, #tpu.memory_space<vmem>>, vector<8x1xf32>,
    %c0_18 = arith.constant 0 : index
    %c0_19 = arith.constant 0 : index
    %27 = vector.load %arg11[%c0_18, %c0_19] : memref<8x32xf32, #tpu.memory_space<vmem>>, vector<8x32xf32>
    %28 = vector.broadcast %17 : vector<8x1xf32> to vector<8x32xf32>
    %29 = arith.mulf %28, %27 : vector<8x32xf32>
    %cst_20 = arith.constant dense<0.000000e+00> : vector<8x32xf32>
    %30 = tpu.matmul %20, %7, %cst_20 {dimension_numbers = #tpu.dot_dimension_numbers<[1], [0], [0], [1], [0, 0, 1, 1], [], []>} : vector<8x128xf32>, vector<128x32xf32>, vector<8x32xf32> -> vector<8x32xf32>
    %31 = arith.addf %29, %30 : vector<8x32xf32>
    %c0_21 = arith.constant 0 : index
    %c0_22 = arith.constant 0 : index
    %32 = vector.load %arg11[%c0_21, %c0_22] : memref<8x32xf32, #tpu.memory_space<vmem>>, vector<8x32xf32>
    tpu.vector_store %arg11[%c0_21, %c0_22], %31 {strides = array<i32>} : memref<8x32xf32, #tpu.memory_space<vmem>>, vector<8x32xf32>,
    %c0_23 = arith.constant 0 : index
    %c0_24 = arith.constant 0 : index
    %33 = vector.load %arg9[%c0_23, %c0_24] : memref<8x1xf32, #tpu.memory_space<vmem>>, vector<8x1xf32>
    tpu.vector_store %arg9[%c0_23, %c0_24], %15 {strides = array<i32>} : memref<8x1xf32, #tpu.memory_space<vmem>>, vector<8x1xf32>,
    %c0_i32_25 = arith.constant 0 : i32
    %34 = arith.cmpi eq, %arg2, %c0_i32_25 : i32
    %35 = arith.extui %34 : i1 to i32
    %c0_i32_26 = arith.constant 0 : i32
    %36 = arith.cmpi ne, %35, %c0_i32_26 : i32
    scf.if %36 {
      %c0_27 = arith.constant 0 : index
      %c0_28 = arith.constant 0 : index
      %37 = vector.load %arg10[%c0_27, %c0_28] : memref<8x1xf32, #tpu.memory_space<vmem>>, vector<8x1xf32>
      %cst_29 = arith.constant 1.000000e+00 : f32
      %38 = vector.broadcast %cst_29 : f32 to vector<8x1xf32>
      %39 = arith.divf %38, %37 : vector<8x1xf32>
      %c0_30 = arith.constant 0 : index
      %c0_31 = arith.constant 0 : index
      %40 = vector.load %arg11[%c0_30, %c0_31] : memref<8x32xf32, #tpu.memory_space<vmem>>, vector<8x32xf32>
      %41 = vector.broadcast %39 : vector<8x1xf32> to vector<8x32xf32>
      %42 = arith.mulf %40, %41 : vector<8x32xf32>
      %c0_32 = arith.constant 0 : index
      %c0_33 = arith.constant 0 : index
      %c0_34 = arith.constant 0 : index
      %43 = vector.load %arg7[%c0_32, %c0_33, %c0_34] : memref<1x8x32xf32, #tpu.memory_space<vmem>>, vector<1x8x32xf32>
      %44 = vector.shape_cast %43 : vector<1x8x32xf32> to vector<8x32xf32>
      %45 = vector.shape_cast %42 : vector<8x32xf32> to vector<1x8x32xf32>
      tpu.vector_store %arg7[%c0_32, %c0_33, %c0_34], %45 {strides = array<i32>} : memref<1x8x32xf32, #tpu.memory_space<vmem>>, vector<1x8x32xf32>,
    } else {
    }
    return
  }
  func.func @transform_0(%arg0: i32, %arg1: i32, %arg2: i32) -> (i32, i32, i32) {
    %c0_i32 = arith.constant 0 : i32
    %c0_i32_0 = arith.constant 0 : i32
    return %arg0, %arg1, %c0_i32 : i32, i32, i32
  }
  func.func @transform_1(%arg0: i32, %arg1: i32, %arg2: i32) -> (i32, i32, i32) {
    %c0_i32 = arith.constant 0 : i32
    %c0_i32_0 = arith.constant 0 : i32
    return %arg0, %arg2, %c0_i32 : i32, i32, i32
  }
  func.func @transform_2(%arg0: i32, %arg1: i32, %arg2: i32) -> (i32, i32, i32) {
    %c0_i32 = arith.constant 0 : i32
    %c0_i32_0 = arith.constant 0 : i32
    return %arg0, %arg2, %c0_i32 : i32, i32, i32
  }
  func.func @transform_3(%arg0: i32, %arg1: i32, %arg2: i32) -> (i32, i32) {
    %c0_i32 = arith.constant 0 : i32
    %c0_i32_0 = arith.constant 0 : i32
    return %c0_i32, %arg2 : i32, i32
  }
  func.func @transform_4(%arg0: i32, %arg1: i32, %arg2: i32) -> (i32, i32, i32) {
    %c0_i32 = arith.constant 0 : i32
    %c0_i32_0 = arith.constant 0 : i32
    return %arg0, %arg1, %c0_i32 : i32, i32, i32
  }
}

</mosaic_0001>

<bundles_post_ra>
// kernel: tpu_custom_call.1
= control target key start
LH: loop header
LB: loop body
LE: loop exit
PB: predicated region body
PF: predicated region fallthrough
CT: control target
= control target key end

     0   :  { %9 = vsyncpa [#allocation7], 0  ;;  %s1323_s0 = inlined_call_operand.vmem [shape: f32[2,8,32], index: 0, kind: input, shape index: {}]   ;;  %s1324_s1 = inlined_call_operand.vmem [shape: f32[2,128,32], index: 1, kind: input, shape index: {}]   ;;  %s1325_s2 = inlined_call_operand.vmem [shape: f32[2,128,32], index: 2, kind: input, shape index: {}]   ;;  %s1326_s3 = inlined_call_operand.vmem [shape: f32[1,128], index: 3, kind: input, shape index: {}]   ;;  %s1327_s4 = inlined_call_operand.hbm [shape: f32[2,8,32], index: 4, kind: output, shape index: {}]  }
   0x1   :  { %11 = vsyncpa [#allocation7 + $0x1], 0  ;;  %s1111_s15 = smov 0   ;;  %s1113_s16 = smov 0  }
   0x2   :  { %s1115_s17 = smov 0   ;;  %s1117_s18 = smov 0  }
   0x3   :  { %s1119_s19 = smov 0   ;;  %s1121_s20 = smov 0  }
   0x4 LB: > { %s736_s21 = sadd.s32 4294967295, %s1078_s20   ;;  %s737_s22 = sadd.s32 4294967294, %s1078_s20   ;;  %s1078_s20 = sphi %s1121_s20, %s17_s20   ;;  %s1074_s19 = sphi %s1119_s19, %s1336_s19   ;;  %s1070_s18 = sphi %s1117_s18, %s1335_s18   ;;  %s1066_s17 = sphi %s1115_s17, %s1334_s17   ;;  %s1062_s16 = sphi %s1113_s16, %s1333_s16   ;;  %s1058_s15 = sphi %s1111_s15, %s1332_s15  }
   0x5   : > { %s36_s23 = sadd.s32 1, %s1074_s19  ;;  %s155_s24 = sadd.s32 1, %s1066_s17 }
   0x6   : > { %p38_p0 = scmp.ge.s32.totalorder %s36_s23, 2  ;;  %p165_p1 = scmp.ne.s32.totalorder %s1066_s17, %s1062_s16 }
   0x7   : > { %p166_p2 = scmp.eq.s32.totalorder %s736_s21, 1  ;;  %p171_p3 = scmp.ne.s32.totalorder %s1062_s16, %s1058_s15 }
   0x8   : > { %s1338_s23 = smov (%p38_p0, %s36_s23), 0  ;;  %p172_p5 = scmp.eq.s32.totalorder %s737_s22, 1 }
   0x9   : > { %p1151_p4 = por %p166_p2, %p165_p1  ;;  %s150_s26 = ssub.s32 %s1074_s19, %s1338_s23 }
   0xa   : > { %p741_p6 = scmp.ge.s32.totalorder %s1078_s20, 1  ;;  %p153_p7 = scmp.eq.s32.totalorder %s150_s26, 0 }
   0xb   : > { %p1158_p8 = por %p172_p5, %p171_p3  ;;  %p232_p9 = scmp.lt.s32.totalorder %s1078_s20, 3 }
   0xc   : > { %s1164_s28 = scalar_select %p153_p7, %s1066_s17, %s155_s24  }
   0xd   : > { %p233_p10 = pnand %p741_p6, %p232_p9 }
   0xe   : > { %p281_p11 = scmp.lt.s32.totalorder (!%p233_p10), %s1070_s18, 1  ;;  %vm317_vm0 = vcmask (!%p233_p10), 261120   ;;  %vm319_vm1 = vcmask (!%p233_p10), 7168   ;;  %v1080_v0 = vmov (!%p233_p10), 0.0|0.0   ;;  %v1081_v1 = vmov (!%p233_p10), 0.0   ;;  %s278_s24 = sand.u32 (!%p233_p10), 1, %s1062_s16  }
   0xf   : > { %236 = sbr.rel (%p233_p10) target bundleno = 899 (0x383), region = 36  ;;  %876 = vmatprep.subr.bf16.mxu0 (!%p233_p10), %v1080_v0  ;;  %321 = vst.msk [vmem:[#allocation4] sm:$0xff] (!%p233_p10), %vm319_vm1, %v1081_v1  ;;  %908 = vmatprep.subr.bf16.mxu1 (!%p233_p10), %v1080_v0  ;;  %vm1082_vm2 = vmmov (!%p233_p10), 0   ;;  %vm1188_vm3 = vmpackc.low (!%p233_p10), %vm317_vm0, %vm317_vm0  ;;  %v1083_v30 = vmov (!%p233_p10), -inf   ;;  %v748_v31 = vld [vmem:[%s1326_s3] ss:$0 sm:$0xff] (!%p233_p10) }
  0x10   : > { %322 = vst.msk [vmem:[#allocation5] sm:$0xff] (!%p233_p10), %vm317_vm0, %v1081_v1  ;;  %838 = vmatprep.mubr.msk.f32.mxu0 (!%p233_p10), %vm1082_vm2, %v1081_v1  ;;  %873 = vmatprep.mubr.msk.f32.mxu1 (!%p233_p10), %vm1082_vm2, %v1081_v1  ;;  %v1084_v35 = vmov (!%p233_p10), 0   ;;  %s742_s26 = sshll.u32 (!%p233_p10), %s278_s24, 3  ;;  %s600_s9 = scalar_lea.sflag (!%p233_p10), [#allocation7], %s278_s24 }
  0x11   : > { %320 = vst.msk [vmem:[#allocation3] sm:$0xff] (!%p233_p10), %vm319_vm1, %v1083_v30  ;;  %992 = vset.pattern.permute.xlu0 (!%p233_p10), %v1084_v35  ;;  %993 = vset.pattern.permute.xlu1 (!%p233_p10), %v1084_v35 }
  0x16   : > { %s1172_s29 = scalar_select %p281_p11, %s1070_s18, 1 }
  0x18   : > { %s743_s30 = sshll.u32 %s1172_s29, 3  ;;  %s770_s5 = sshll.u32 %s1172_s29, 7  ;;  %v485_v51 = vld [vmem:[#allocation3] sm:$0xff] }
  0x19   : > { %s287_s8 = scalar_lea.vmem %s1323_s0, %s743_s30  ;;  %s1184_s11 = scalar_lea.vmem %s1324_s1, %s770_s5 }
  0x1a   : > { %v315_v3 = vld [vmem:[%s287_s8] sm:$0xff]  ;;  %v325_v5 = vld [vmem:[%s1184_s11 + $0x8] sm:$0xff]  ;;  %v326_v8 = vld [vmem:[%s1184_s11 + $0x10] sm:$0xff]  ;;  %s1242_s22 = scalar_lea.vmem %s1325_s2, %s770_s5  ;;  %s767_s29 = sshll.u32 %s1070_s18, 7 }
  0x1b   : > { %v324_v4 = vld [vmem:[%s1184_s11] sm:$0xff]  ;;  %v316_v6 = vmul.f32 0.25503486, %v315_v3  ;;  %v327_v9 = vld [vmem:[%s1184_s11 + $0x18] sm:$0xff]  ;;  %v329_v12 = vld [vmem:[%s1184_s11 + $0x28] sm:$0xff]  ;;  %s280_s30 = scalar_lea.vmem [#allocation6], %s742_s26  ;;  %s1275_s8 = scalar_lea.hbm %s1327_s4, %s767_s29 }
  0x1c   : > { %v877_v7 = vpack.c.bf16 %v325_v5, %v324_v4  ;;  %v881_v10 = vpack.c.bf16 %v327_v9, %v326_v8  ;;  %v328_v11 = vld [vmem:[%s1184_s11 + $0x20] sm:$0xff]  ;;  %v330_v14 = vld [vmem:[%s1184_s11 + $0x30] sm:$0xff]  ;;  %v331_v15 = vld [vmem:[%s1184_s11 + $0x38] sm:$0xff]  ;;  %s614_s5 = sshll.u32 %s280_s30, 4  ;;  %s1085_s18 = smov [#allocation6]   ;;  %s1277_s5 = int_to_ptr.vmem [resolvable:$true] %s614_s5 }
  0x1d   : > { %318 = vst.msk [vmem:[#allocation2] sm:$0xff] %vm317_vm0, %v316_v6  ;;  %v885_v13 = vpack.c.bf16 %v329_v12, %v328_v11  ;;  %v889_v16 = vpack.c.bf16 %v331_v15, %v330_v14  ;;  %v332_v17 = vld [vmem:[%s1184_s11 + $0x40] sm:$0xff]  ;;  %v333_v18 = vld [vmem:[%s1184_s11 + $0x48] sm:$0xff]  ;;  %v334_v20 = vld [vmem:[%s1184_s11 + $0x50] sm:$0xff]  ;;  %s1000_s10 = scalar_lea.vmem %s1277_s5, 128 }
  0x1e   : > { %879 = vmatpush3.bf16.xpose.msk.msra.mxu0 %vm1188_vm3, %v877_v7  ;;  %v893_v19 = vpack.c.bf16 %v333_v18, %v332_v17  ;;  %v335_v21 = vld [vmem:[%s1184_s11 + $0x58] sm:$0xff]  ;;  %v336_v23 = vld [vmem:[%s1184_s11 + $0x60] sm:$0xff]  ;;  %v337_v24 = vld [vmem:[%s1184_s11 + $0x68] sm:$0xff]  ;;  %p1001_p12 = scmp.ne.s32.totalorder %s1277_s5, %s1000_s10 }
  0x1f   : > { %880 = vmatprep.subr.bf16.mxu0 %v1080_v0  ;;  %v897_v22 = vpack.c.bf16 %v335_v21, %v334_v20  ;;  %v901_v25 = vpack.c.bf16 %v337_v24, %v336_v23  ;;  %v338_v26 = vld [vmem:[%s1184_s11 + $0x70] sm:$0xff]  ;;  %v339_v27 = vld [vmem:[%s1184_s11 + $0x78] sm:$0xff]  ;;  %v340_v36 = vld [vmem:[%s1242_s22] sm:$0xff]  ;;  %s1004_s11 = sshll.u32 %s1085_s18, 4  ;;  %s1005_s11 = int_to_ptr.vmem [resolvable:$false] %s1004_s11 }
  0x20   : > { %v905_v28 = vpack.c.bf16 %v339_v27, %v338_v26  ;;  %v341_v37 = vld [vmem:[%s1242_s22 + $0x8] sm:$0xff]  ;;  %v342_v38 = vld [vmem:[%s1242_s22 + $0x10] sm:$0xff]  ;;  %v343_v40 = vld [vmem:[%s1242_s22 + $0x18] sm:$0xff]  ;;  %p1002_p13 = pnand %p1001_p12, %p1151_p4  ;;  %s1006_s12 = scalar_lea.vmem %s1005_s11, 256 }
  0x21   : > { %v909_v39 = vpack.c.bf16 %v341_v37, %v340_v36  ;;  %v912_v41 = vpack.c.bf16 %v343_v40, %v342_v38  ;;  %v344_v42 = vld [vmem:[%s1242_s22 + $0x20] sm:$0xff]  ;;  %v345_v43 = vld [vmem:[%s1242_s22 + $0x28] sm:$0xff]  ;;  %v346_v45 = vld [vmem:[%s1242_s22 + $0x30] sm:$0xff]  ;;  %p1007_p1 = scmp.lt.s32.totalorder %s1277_s5, %s1005_s11  ;;  %p1008_p2 = scmp.lt.s32.totalorder %s1006_s12, %s1000_s10 }
  0x22   : > { %v915_v44 = vpack.c.bf16 %v345_v43, %v344_v42  ;;  %v347_v46 = vld [vmem:[%s1242_s22 + $0x38] sm:$0xff]  ;;  %v348_v48 = vld [vmem:[%s1242_s22 + $0x40] sm:$0xff]  ;;  %v349_v49 = vld [vmem:[%s1242_s22 + $0x48] sm:$0xff]  ;;  %p1003_p0 = pneg %p1002_p13 }
  0x23   : > { %910 = vmatpush3.bf16.msra.mxu1 %v909_v39  ;;  %v918_v47 = vpack.c.bf16 %v347_v46, %v346_v45  ;;  %v921_v50 = vpack.c.bf16 %v349_v49, %v348_v48  ;;  %v350_v54 = vld [vmem:[%s1242_s22 + $0x50] sm:$0xff]  ;;  %v351_v55 = vld [vmem:[%s1242_s22 + $0x58] sm:$0xff]  ;;  %v352_v58 = vld [vmem:[%s1242_s22 + $0x60] sm:$0xff]  ;;  %p1009_p3 = por %p1008_p2, %p1007_p1 }
  0x24   : > { %v323_v29 = vld [vmem:[#allocation2] sm:$0xff]  ;;  %911 = vmatprep.subr.bf16.mxu1 %v1080_v0  ;;  %v924_v57 = vpack.c.bf16 %v351_v55, %v350_v54  ;;  %v353_v59 = vld [vmem:[%s1242_s22 + $0x68] sm:$0xff]  ;;  %v354_v61 = vld [vmem:[%s1242_s22 + $0x70] sm:$0xff] }
  0x25   : > { %v927_v60 = vpack.c.bf16 %v353_v59, %v352_v58  ;;  %v355_v62 = vld [vmem:[%s1242_s22 + $0x78] sm:$0xff]  ;;  %v498_v5 = vld [vmem:[#allocation4] sm:$0xff]  ;;  %p1010_p5 = pnand %p1009_p3, %p1003_p0 }
  0x26   : > { %883 = vmatpush3.bf16.xpose.msk.msra.mxu0 %vm1188_vm3, %v881_v10  ;;  %v930_v63 = vpack.c.bf16 %v355_v62, %v354_v61  ;;  %v505_v10 = vld [vmem:[#allocation5] sm:$0xff] }
  0x27   : > { %884 = vmatprep.subr.bf16.mxu0 %v1080_v0  ;;  %913 = vmatpush3.bf16.msra.mxu1 %v912_v41 }
  0x28   : > { %914 = vmatprep.subr.bf16.mxu1 %v1080_v0 }
  0x2b   : > { %916 = vmatpush3.bf16.msra.mxu1 %v915_v44 }
  0x2c   : > { %917 = vmatprep.subr.bf16.mxu1 %v1080_v0 }
  0x2e   : > { %887 = vmatpush3.bf16.xpose.msk.msra.mxu0 %vm1188_vm3, %v885_v13 }
  0x2f   : > { %888 = vmatprep.subr.bf16.mxu0 %v1080_v0  ;;  %919 = vmatpush3.bf16.msra.mxu1 %v918_v47 }
  0x30   : > { %920 = vmatprep.subr.bf16.mxu1 %v1080_v0 }
  0x33   : > { %922 = vmatpush3.bf16.msra.mxu1 %v921_v50 }
  0x34   : > { %923 = vmatprep.subr.bf16.mxu1 %v1080_v0 }
  0x36   : > { %891 = vmatpush3.bf16.xpose.msk.msra.mxu0 %vm1188_vm3, %v889_v16 }
  0x37   : > { %892 = vmatprep.subr.bf16.mxu0 %v1080_v0  ;;  %925 = vmatpush3.bf16.msra.mxu1 %v924_v57 }
  0x38   : > { %926 = vmatprep.subr.bf16.mxu1 %v1080_v0 }
  0x3b   : > { %928 = vmatpush3.bf16.msra.mxu1 %v927_v60 }
  0x3c   : > { %929 = vmatprep.subr.bf16.mxu1 %v1080_v0 }
  0x3e   : > { %895 = vmatpush3.bf16.xpose.msk.msra.mxu0 %vm1188_vm3, %v893_v19 }
  0x3f   : > { %896 = vmatprep.subr.bf16.mxu0 %v1080_v0  ;;  %931 = vmatpush3.bf16.msra.mxu1 %v930_v63 }
  0x46   : > { %899 = vmatpush3.bf16.xpose.msk.msra.mxu0 %vm1188_vm3, %v897_v22 }
  0x47   : > { %900 = vmatprep.subr.bf16.mxu0 %v1080_v0 }
  0x4e   : > { %903 = vmatpush3.bf16.xpose.msk.msra.mxu0 %vm1188_vm3, %v901_v25 }
  0x4f   : > { %904 = vmatprep.subr.bf16.mxu0 %v1080_v0 }
  0x56   : > { %907 = vmatpush3.bf16.xpose.msk.msra.mxu0 %vm1188_vm3, %v905_v28 }
  0x5d   : > { %839 = vmatmul.mubr.msk.f32.vlgmr.msra.gmra.mrb[0].mxu0 %vm317_vm0, %v323_v29 }
 0x130   : > { %v481_v32 = vpop.f32.mrb[0].mxu0 }
 0x131   : > { %v482_v33 = vadd.f32 %v748_v31, %v481_v32  ;;  %v840_v34 = vpop.f32.mrb[1].mxu0 }
 0x133   : > { %486 = vmax.xlane.f32.xlu0 %v482_v33 }
 0x1c0   : > { %v487_v52 = vpop.xlane.xlu0 %486 }
 0x1c1   : > { %v488_v53 = vmax.f32 %v485_v51, %v487_v52 }
 0x1c3   : > { %v489_v56 = vsub.f32 %v485_v51, %v488_v53  ;;  %584 = vst.msk [vmem:[#allocation3] sm:$0xff] %vm319_vm1, %v488_v53  ;;  %493 = vperm.xlu0 %992, %v488_v53  }
 0x242   : > { %v494_v1 = vpop.permute.xlu0 %493 }
 0x243   : > { %v496_v2 = vsub.f32 %v482_v33, %v494_v1 }
 0x245   : > { %994 = vpow2.f32 %v496_v2 }
 0x246   : > { %996 = vpow2.f32 %v489_v56 }
 0x24f   : > { %v995_v3 = vpop.eup %994 }
 0x250   : > { %500 = vadd.xlane.f32.xlu1 %v995_v3  ;;  %874 = vmatmul.mubr.f32.vlgmr.msra.gmra.mrb[0].mxu1 %v995_v3  ;;  %v997_v4 = vpop.eup %996 }
 0x251   : > { %v499_v6 = vmul.f32 %v997_v4, %v498_v5 }
 0x261   : > { %508 = vperm.xlu1 %993, %v997_v4  }
 0x2dd   : > { %v501_v7 = vpop.xlane.xlu1 %500 }
 0x2de   : > { %v502_v8 = vadd.f32 %v501_v7, %v499_v6 }
 0x2e0   : > { %504 = vst.msk [vmem:[#allocation4] sm:$0xff] %vm319_vm1, %v502_v8 }
 0x2e1   : > { %v509_v11 = vpop.permute.xlu1 %508 }
 0x2e2   : > { %v511_v12 = vmul.f32 %v509_v11, %v505_v10 }
 0x2e7   : > { %v588_v9 = vld [vmem:[#allocation4] sm:$0xff] }
 0x2e8   : > { %998 = vrcp.f32 %v588_v9 }
 0x2f2   : > { %v999_v0 = vpop.eup %998 }
 0x2f3   : > { %594 = vperm.xlu1 %993, %v999_v0  }
 0x323   : > { %v578_v13 = vpop.f32.mrb[0].mxu1 }
 0x324   : > { %v582_v14 = vadd.f32 %v578_v13, %v511_v12  ;;  %v875_v15 = vpop.f32.mrb[1].mxu1 }
 0x326   : > { %583 = vst.msk [vmem:[#allocation5] sm:$0xff] %vm317_vm0, %v582_v14 }
 0x32d   : > { %v591_v16 = vld [vmem:[#allocation5] sm:$0xff] }
 0x372   : > { %v595_v17 = vpop.permute.xlu1 %594 }
 0x373   : > { %v597_v18 = vmul.f32 %v595_v17, %v591_v16 }
 0x375   : > { %598 = vst.msk [vmem:[%s280_s30] sm:$0xff] %vm317_vm0, %v597_v18 }
 0x376   : > { %1013 = shalt.err (!%p1010_p5)
}
 0x377   : > { %s1014_s13 = scalar_lea.hbm %s1275_s8, 128  ;;  %s1018_s22 = scalar_lea.hbm %s1327_s4, 256 }
 0x378   : > { %p1015_p6 = scmp.ne.s32.totalorder %s1275_s8, %s1014_s13  ;;  %p1019_p10 = scmp.lt.u32.totalorder %s1275_s8, %s1327_s4 }
 0x379   : > { %p1020_p11 = scmp.lt.u32.totalorder %s1018_s22, %s1014_s13  ;;  %p1022_p13 = scmp.lt.u32.totalorder %s1014_s13, %s1275_s8 }
 0x37a   : > { %p1016_p7 = pnand %p1015_p6, %p1151_p4 }
 0x37b   : > { %p1021_p12 = por %p1020_p11, %p1019_p10 }
 0x37c   : > { %p1017_p9 = pneg %p1016_p7 }
 0x37d   : > { %p1023_p0 = por %p1022_p13, %p1021_p12 }
 0x37f   : > { %p1024_p1 = pnand %p1023_p0, %p1017_p9 }
 0x381   : > { %1027 = shalt.err (!%p1024_p1)
}
 0x382   : > { %932 = dma.vmem_to_hbm [thread:$0]  (%p1151_p4), %s1277_s5, 128, %s1275_s8, %s600_s9  }
 0x383 PF: > { %p938_p2 = scmp.ge.s32.totalorder %s1078_s20, 2  ;;  %s626_s29 = sand.u32 1, %s1058_s15  }
 0x384   : > { %s627_s30 = scalar_lea.sflag [#allocation7], %s626_s29 }
 0x385   : > { %p935_p3 = pnand %p938_p2, %p1158_p8 }
 0x387   : > { %1053 = dma.done.wait (!%p935_p3), %s627_s30, 128  }
 0x388   : > { %1055 = vsyncadd (!%p935_p3), %s627_s30, 4294967168  ;;  %s17_s20 = sadd.s32 1, %s1078_s20   ;;  %s1332_s15 = smov %s1062_s16 }
 0x389   : > { %p14_p5 = scmp.ge.s32.totalorder %s17_s20, 4   ;;  %s1333_s16 = smov %s1066_s17 }
 0x38a   : > { %s1334_s17 = smov %s1164_s28  ;;  %s1335_s18 = smov %s1074_s19 }
 0x38b   : > { %s1336_s19 = smov %s1338_s23  ;;  %16 = sbr.rel (!%p14_p5) target bundleno = 4 (0x4), region = 88 }
 0x392   :  { %632 = vsyncpa [#allocation7], 1 }
 0x393   :  { %634 = vsyncpa [#allocation7 + $0x1], 1 }

</bundles_post_ra>
